<compile_context>
chip_gen: v6e
topology: v6e:2x2x1
jax: 0.10.0
libtpu: 0.0.40
codegen_flags: <defaults>
</compile_context>

<pallas_src>
import jax
import jax.numpy as jnp
from jax.experimental import pallas as pl
from jax.experimental.pallas import tpu as pltpu

BN_EPS = 1e-5
LANE = 128


def encoder1_kernel(alphas_ref, a_ref, x_ref, w_ref, params_ref, o_ref):
    # TODO(synk): dropout on the input is identity here (inference / p=0);
    # training-mode RNG dropout (pltpu.prng_seed + prng_random_bits) not reproduced.
    # TODO(synk): BatchNorm uses batch statistics (training-mode forward) and does
    # not consume/update running_mean / running_var.

    # GraphConv (norm='both'): project-then-aggregate == aggregate-then-project
    # for a linear layer; projecting first keeps the intermediate small.
    xw = jnp.dot(x_ref[...], w_ref[...], preferred_element_type=jnp.float32)
    h = jnp.dot(a_ref[...], xw, preferred_element_type=jnp.float32)
    h = h + params_ref[0:1, :]                      # conv bias, [1, Fp] broadcast

    # GraphConv activation: PReLU with a single learnable alpha (SMEM scalar).
    a_conv = alphas_ref[0]
    h = jnp.where(h > 0, h, a_conv * h)

    # BatchNorm1d, one-pass stats over the node axis (biased variance), with the
    # affine transform folded into a single per-feature scale/shift.
    inv_n = 1.0 / h.shape[0]
    mean = jnp.sum(h, axis=0, keepdims=True) * inv_n
    ex2 = jnp.sum(h * h, axis=0, keepdims=True) * inv_n
    var = ex2 - mean * mean
    scale = params_ref[1:2, :] * jax.lax.rsqrt(var + BN_EPS)   # gamma * rsqrt(var+eps)
    shift = params_ref[2:3, :] - mean * scale                  # beta - mean*scale
    hn = h * scale + shift

    # Outer PReLU (SMEM scalar alpha). Output tile is 128-lane dense (unmasked vst).
    a_out = alphas_ref[1]
    o_ref[...] = jnp.where(hn > 0, hn, a_out * hn)


def _pad_lane(v, f_pad):
    v = v.reshape(1, -1).astype(jnp.float32)
    return jnp.pad(v, ((0, 0), (0, f_pad - v.shape[1])))


def encoder1_prepare(w, b, gamma, beta, a_conv, a_out):
    """One-time parameter packing/padding -- hoisted out of the per-call path."""
    f_in, f_out = w.shape
    k_pad = ((f_in + LANE - 1) // LANE) * LANE     # lane-dense contraction dim
    f_pad = ((f_out + LANE - 1) // LANE) * LANE    # lane-dense output dim
    w_p = jnp.pad(w.astype(jnp.float32), ((0, k_pad - f_in), (0, f_pad - f_out)))
    params = jnp.concatenate(
        [_pad_lane(b, f_pad), _pad_lane(gamma, f_pad), _pad_lane(beta, f_pad)],
        axis=0,
    )
    alphas = jnp.stack([a_conv.reshape(()), a_out.reshape(())]).astype(jnp.float32)
    return {"w": w_p, "params": params, "alphas": alphas,
            "f_in": f_in, "f_out": f_out, "k_pad": k_pad, "f_pad": f_pad}


@jax.jit
def _encoder1_pallas(alphas, a_hat, x, w_p, params):
    b_graphs, n, f_in = x.shape
    k_pad, f_pad = w_p.shape
    a_hat = a_hat.astype(jnp.float32)
    x = x.astype(jnp.float32)
    if f_in != k_pad:   # zero-pad K so the first matmul's contraction is lane-dense
        x = jnp.pad(x, ((0, 0), (0, 0), (0, k_pad - f_in)))

    # TODO(synk): for N beyond ~2-4k nodes A_hat [N,N] f32 no longer fits VMEM
    # (v7x 64 MiB ceiling / default scoped limits on v5e-v6e); switch to row-tiled
    # BlockSpecs over A_hat with a persistent XW scratch and a two-phase BatchNorm
    # (stats pass + normalize pass), and cast matmul operands to bf16 on v6e/v7x.
    return pl.pallas_call(
        encoder1_kernel,
        out_shape=jax.ShapeDtypeStruct((b_graphs, n, f_pad), jnp.float32),
        grid=(b_graphs,),
        in_specs=[
            pl.BlockSpec(memory_space=pltpu.MemorySpace.SMEM),       # PReLU alphas
            pl.BlockSpec((None, n, n), lambda b: (b, 0, 0)),         # A_hat per graph
            pl.BlockSpec((None, n, k_pad), lambda b: (b, 0, 0)),     # X per graph
            pl.BlockSpec((k_pad, f_pad), lambda b: (0, 0)),          # W (shared)
            pl.BlockSpec((3, f_pad), lambda b: (0, 0)),              # bias/gamma/beta
        ],
        out_specs=pl.BlockSpec((None, n, f_pad), lambda b: (b, 0, 0)),
        compiler_params=pltpu.CompilerParams(
            dimension_semantics=("parallel",)),   # shards graphs across v7x's 2 TCs
    )(alphas, a_hat, x, w_p, params)


def encoder1_forward_batched(packed, a_hat, x):
    """a_hat [B,N,N], x [B,N,F_in] -> [B,N,F_pad] (128-lane padded activations).

    Padded feature columns are exactly zero; slice [..., :f_out] once at the end
    of the network rather than per call."""
    return _encoder1_pallas(packed["alphas"], a_hat, x, packed["w"], packed["params"])


def encoder1_forward(packed, a_hat, x):
    """Single-graph forward, matching Encoder1.forward(graph, heat)."""
    return encoder1_forward_batched(packed, a_hat[None], x[None])[0]


def build_normalized_adjacency(key, n):
    """Random undirected graph with self-loops, norm='both' normalization."""
    probs = jax.random.uniform(key, (n, n))
    adj = (probs < 0.15).astype(jnp.float32)
    adj = jnp.maximum(adj, adj.T)                          # undirected
    adj = jnp.maximum(adj, jnp.eye(n, dtype=jnp.float32))  # self-loops (deg >= 1)
    deg = jnp.sum(adj, axis=1)
    d_inv_sqrt = 1.0 / jnp.sqrt(deg)
    return adj * d_inv_sqrt[:, None] * d_inv_sqrt[None, :]


def reference_single(a_hat, x, w, b, gamma, beta, alpha):
    """Pure-JAX reference of the same math (one graph)."""
    h = a_hat @ (x @ w) + b
    h = jnp.where(h > 0, h, alpha * h)
    m = h.mean(0, keepdims=True)
    v = ((h - m) ** 2).mean(0, keepdims=True)
    h = (h - m) / jnp.sqrt(v + BN_EPS) * gamma + beta
    return jnp.where(h > 0, h, alpha * h)


if __name__ == "__main__":
    key = jax.random.PRNGKey(0)
    k_g0, k_g1, k_x, k_w = jax.random.split(key, 4)

    B = 2             # graphs per batched call (grid axis)
    N = 64            # nodes per graph
    IN_HIDDEN = 32
    OUT_HIDDEN = 32

    # Inputs / graphs.
    a_hat = jnp.stack([build_normalized_adjacency(k_g0, N),
                       build_normalized_adjacency(k_g1, N)])
    heat = jax.random.normal(k_x, (B, N, IN_HIDDEN), dtype=jnp.float32)

    # Parameters (deterministic init).
    limit = (6.0 / (IN_HIDDEN + OUT_HIDDEN)) ** 0.5
    w = jax.random.uniform(k_w, (IN_HIDDEN, OUT_HIDDEN),
                           minval=-limit, maxval=limit, dtype=jnp.float32)
    b = jnp.zeros((OUT_HIDDEN,), dtype=jnp.float32)
    gamma = jnp.ones((OUT_HIDDEN,), dtype=jnp.float32)
    beta = jnp.zeros((OUT_HIDDEN,), dtype=jnp.float32)
    a_conv = jnp.full((1,), 0.25, dtype=jnp.float32)   # PReLU default alpha
    a_out = jnp.full((1,), 0.25, dtype=jnp.float32)

    # One-time packing (hoisted out of the hot path).
    packed = encoder1_prepare(w, b, gamma, beta, a_conv, a_out)

    # Batched call (B graphs, one pallas_call) + single-graph module-equivalent call.
    out_b = encoder1_forward_batched(packed, a_hat, heat)
    out_s = encoder1_forward(packed, a_hat[0], heat[0])
    jax.block_until_ready((out_b, out_s))

    # Correctness vs. pure-JAX reference (module semantics: one graph per forward).
    for i in range(B):
        ref = reference_single(a_hat[i], heat[i], w, b, gamma, beta, 0.25)
        got = out_b[i, :, :OUT_HIDDEN]     # slice the lane padding only here
        assert got.shape == (N, OUT_HIDDEN)
        assert jnp.allclose(got, ref, atol=1e-4, rtol=1e-4), f"mismatch on graph {i}"
    assert jnp.allclose(out_s, out_b[0], atol=1e-6, rtol=1e-6), "single vs batched mismatch"
    assert jnp.all(out_b[:, :, OUT_HIDDEN:] == 0.0), "padded lanes should be inert zeros"

    print("KERNEL_OK")
</pallas_src>

<mosaic_0001>
module attributes {stable_mosaic.version = 11 : i64} {
  func.func @encoder1_kernel(%arg0: i32, %arg1: memref<2xf32, #tpu.memory_space<smem>>, %arg2: memref<1x64x64xf32, #tpu.memory_space<vmem>>, %arg3: memref<1x64x128xf32, #tpu.memory_space<vmem>>, %arg4: memref<128x128xf32, #tpu.memory_space<vmem>>, %arg5: memref<3x128xf32, #tpu.memory_space<vmem>>, %arg6: memref<1x64x128xf32, #tpu.memory_space<vmem>>) attributes {dimension_semantics = [#tpu.dimension_semantics<parallel>], iteration_bounds = array<i64: 2>, scalar_prefetch = 0 : i64, scratch_operands = 0 : i64, tpu.core_type = #tpu.core_type<tc>, window_params = [{transform_indices = @transform_0, window_bounds = array<i64: 2>}, {transform_indices = @transform_1, window_bounds = array<i64: 1, 64, 64>}, {transform_indices = @transform_2, window_bounds = array<i64: 1, 64, 128>}, {pipeline_mode = #tpu.pipeline_mode<synchronous>, transform_indices = @transform_3, window_bounds = array<i64: 128, 128>}, {pipeline_mode = #tpu.pipeline_mode<synchronous>, transform_indices = @transform_4, window_bounds = array<i64: 3, 128>}, {transform_indices = @transform_5, window_bounds = array<i64: 1, 64, 128>}]} {
    %c0 = arith.constant 0 : index
    %c0_0 = arith.constant 0 : index
    %c0_1 = arith.constant 0 : index
    %0 = vector.load %arg3[%c0, %c0_0, %c0_1] : memref<1x64x128xf32, #tpu.memory_space<vmem>>, vector<1x64x128xf32>
    %1 = vector.shape_cast %0 : vector<1x64x128xf32> to vector<64x128xf32>
    %c0_2 = arith.constant 0 : index
    %c0_3 = arith.constant 0 : index
    %2 = vector.load %arg4[%c0_2, %c0_3] : memref<128x128xf32, #tpu.memory_space<vmem>>, vector<128x128xf32>
    %cst = arith.constant dense<0.000000e+00> : vector<64x128xf32>
    %3 = tpu.matmul %1, %2, %cst {dimension_numbers = #tpu.dot_dimension_numbers<[1], [0], [0], [1], [0, 0, 1, 1], [], []>} : vector<64x128xf32>, vector<128x128xf32>, vector<64x128xf32> -> vector<64x128xf32>
    %c0_4 = arith.constant 0 : index
    %c0_5 = arith.constant 0 : index
    %c0_6 = arith.constant 0 : index
    %4 = vector.load %arg2[%c0_4, %c0_5, %c0_6] : memref<1x64x64xf32, #tpu.memory_space<vmem>>, vector<1x64x64xf32>
    %5 = vector.shape_cast %4 : vector<1x64x64xf32> to vector<64x64xf32>
    %cst_7 = arith.constant dense<0.000000e+00> : vector<64x128xf32>
    %6 = tpu.matmul %5, %3, %cst_7 {dimension_numbers = #tpu.dot_dimension_numbers<[1], [0], [0], [1], [0, 0, 1, 1], [], []>} : vector<64x64xf32>, vector<64x128xf32>, vector<64x128xf32> -> vector<64x128xf32>
    %c0_8 = arith.constant 0 : index
    %c0_9 = arith.constant 0 : index
    %7 = vector.load %arg5[%c0_8, %c0_9] : memref<3x128xf32, #tpu.memory_space<vmem>>, vector<1x128xf32>
    %8 = vector.broadcast %7 : vector<1x128xf32> to vector<64x128xf32>
    %9 = arith.addf %6, %8 : vector<64x128xf32>
    %c0_10 = arith.constant 0 : index
    %10 = memref.load %arg1[%c0_10] : memref<2xf32, #tpu.memory_space<smem>>
    %cst_11 = arith.constant 0.000000e+00 : f32
    %11 = vector.broadcast %cst_11 : f32 to vector<64x128xf32>
    %12 = arith.cmpf ogt, %9, %11 : vector<64x128xf32>
    %13 = vector.broadcast %10 : f32 to vector<64x128xf32>
    %14 = arith.mulf %13, %9 : vector<64x128xf32>
    %15 = arith.select %12, %9, %14 : vector<64x128xi1>, vector<64x128xf32>
    %cst_12 = arith.constant dense<0.000000e+00> : vector<128xf32>
    %16 = vector.multi_reduction <add>, %15, %cst_12 [0] : vector<64x128xf32> to vector<128xf32>
    %17 = vector.shape_cast %16 : vector<128xf32> to vector<1x128xf32>
    %cst_13 = arith.constant 1.562500e-02 : f32
    %18 = vector.broadcast %cst_13 : f32 to vector<1x128xf32>
    %19 = arith.mulf %17, %18 : vector<1x128xf32>
    %20 = arith.mulf %15, %15 : vector<64x128xf32>
    %cst_14 = arith.constant dense<0.000000e+00> : vector<128xf32>
    %21 = vector.multi_reduction <add>, %20, %cst_14 [0] : vector<64x128xf32> to vector<128xf32>
    %22 = vector.shape_cast %21 : vector<128xf32> to vector<1x128xf32>
    %cst_15 = arith.constant 1.562500e-02 : f32
    %23 = vector.broadcast %cst_15 : f32 to vector<1x128xf32>
    %24 = arith.mulf %22, %23 : vector<1x128xf32>
    %25 = arith.mulf %19, %19 : vector<1x128xf32>
    %26 = arith.subf %24, %25 : vector<1x128xf32>
    %c1 = arith.constant 1 : index
    %c0_16 = arith.constant 0 : index
    %27 = vector.load %arg5[%c1, %c0_16] : memref<3x128xf32, #tpu.memory_space<vmem>>, vector<1x128xf32>
    %cst_17 = arith.constant 9.99999974E-6 : f32
    %28 = vector.broadcast %cst_17 : f32 to vector<1x128xf32>
    %29 = arith.addf %26, %28 : vector<1x128xf32>
    %30 = math.rsqrt %29 : vector<1x128xf32>
    %31 = arith.mulf %27, %30 : vector<1x128xf32>
    %c2 = arith.constant 2 : index
    %c0_18 = arith.constant 0 : index
    %32 = vector.load %arg5[%c2, %c0_18] : memref<3x128xf32, #tpu.memory_space<vmem>>, vector<1x128xf32>
    %33 = arith.mulf %19, %31 : vector<1x128xf32>
    %34 = arith.subf %32, %33 : vector<1x128xf32>
    %35 = vector.broadcast %31 : vector<1x128xf32> to vector<64x128xf32>
    %36 = arith.mulf %15, %35 : vector<64x128xf32>
    %37 = vector.broadcast %34 : vector<1x128xf32> to vector<64x128xf32>
    %38 = arith.addf %36, %37 : vector<64x128xf32>
    %c1_19 = arith.constant 1 : index
    %39 = memref.load %arg1[%c1_19] : memref<2xf32, #tpu.memory_space<smem>>
    %cst_20 = arith.constant 0.000000e+00 : f32
    %40 = vector.broadcast %cst_20 : f32 to vector<64x128xf32>
    %41 = arith.cmpf ogt, %38, %40 : vector<64x128xf32>
    %42 = vector.broadcast %39 : f32 to vector<64x128xf32>
    %43 = arith.mulf %42, %38 : vector<64x128xf32>
    %44 = arith.select %41, %38, %43 : vector<64x128xi1>, vector<64x128xf32>
    %c0_21 = arith.constant 0 : index
    %c0_22 = arith.constant 0 : index
    %c0_23 = arith.constant 0 : index
    %45 = vector.load %arg6[%c0_21, %c0_22, %c0_23] : memref<1x64x128xf32, #tpu.memory_space<vmem>>, vector<1x64x128xf32>
    %46 = vector.shape_cast %45 : vector<1x64x128xf32> to vector<64x128xf32>
    %47 = vector.shape_cast %44 : vector<64x128xf32> to vector<1x64x128xf32>
    tpu.vector_store %arg6[%c0_21, %c0_22, %c0_23], %47 {strides = array<i32>} : memref<1x64x128xf32, #tpu.memory_space<vmem>>, vector<1x64x128xf32>,
    return
  }
  func.func @transform_0(%arg0: i32) -> i32 {
    %c0_i32 = arith.constant 0 : i32
    %c0_i32_0 = arith.constant 0 : i32
    return %c0_i32 : i32
  }
  func.func @transform_1(%arg0: i32) -> (i32, i32, i32) {
    %c0_i32 = arith.constant 0 : i32
    %c0_i32_0 = arith.constant 0 : i32
    %c0_i32_1 = arith.constant 0 : i32
    return %arg0, %c0_i32, %c0_i32_0 : i32, i32, i32
  }
  func.func @transform_2(%arg0: i32) -> (i32, i32, i32) {
    %c0_i32 = arith.constant 0 : i32
    %c0_i32_0 = arith.constant 0 : i32
    %c0_i32_1 = arith.constant 0 : i32
    return %arg0, %c0_i32, %c0_i32_0 : i32, i32, i32
  }
  func.func @transform_3(%arg0: i32) -> (i32, i32) {
    %c0_i32 = arith.constant 0 : i32
    %c0_i32_0 = arith.constant 0 : i32
    %c0_i32_1 = arith.constant 0 : i32
    return %c0_i32, %c0_i32_0 : i32, i32
  }
  func.func @transform_4(%arg0: i32) -> (i32, i32) {
    %c0_i32 = arith.constant 0 : i32
    %c0_i32_0 = arith.constant 0 : i32
    %c0_i32_1 = arith.constant 0 : i32
    return %c0_i32, %c0_i32_0 : i32, i32
  }
  func.func @transform_5(%arg0: i32) -> (i32, i32, i32) {
    %c0_i32 = arith.constant 0 : i32
    %c0_i32_0 = arith.constant 0 : i32
    %c0_i32_1 = arith.constant 0 : i32
    return %arg0, %c0_i32, %c0_i32_0 : i32, i32, i32
  }
}

</mosaic_0001>

<bundles_post_ra>
// kernel: _encoder1_pallas.1
= control target key start
LH: loop header
LB: loop body
LE: loop exit
PB: predicated region body
PF: predicated region fallthrough
CT: control target
= control target key end

     0   :  { %10 = vsyncpa [#allocation4], 0  ;;  %s1322_s0 = inlined_call_operand.vmem [shape: f32[2], index: 0, kind: input, shape index: {}]   ;;  %s1323_s1 = inlined_call_operand.vmem [shape: f32[2,64,64], index: 1, kind: input, shape index: {}]   ;;  %s1324_s2 = inlined_call_operand.vmem [shape: f32[2,64,128], index: 2, kind: input, shape index: {}]   ;;  %s1325_s3 = inlined_call_operand.vmem [shape: f32[128,128], index: 3, kind: input, shape index: {}]   ;;  %s1326_s4 = inlined_call_operand.vmem [shape: f32[3,128], index: 4, kind: input, shape index: {}]   ;;  %s1327_s5 = inlined_call_operand.hbm [shape: f32[2,64,128], index: 5, kind: output, shape index: {}]  }
   0x1   :  { %11 = vsyncpa [#allocation3], 0 }
   0x2   :  { %13 = vsyncpa [#allocation3 + $0x1], 0  ;;  %s1068_s18 = smov 0   ;;  %s1070_s19 = smov 0  }
   0x3   :  { %s1072_s20 = smov 0   ;;  %s1074_s21 = smov 0  }
   0x4 LB: > { %s1089_s22 = sadd.s32 4294967295, %s1032_s21   ;;  %s758_s23 = sadd.s32 4294967294, %s1032_s21   ;;  %s1032_s21 = sphi %s1074_s21, %s1334_s21   ;;  %s1028_s20 = sphi %s1072_s20, %s1333_s20   ;;  %s1024_s19 = sphi %s1070_s19, %s1332_s19   ;;  %s1020_s18 = sphi %s1068_s18, %s1331_s18  }
   0x5   : > { %s1093_s24 = sadd.s32 1, %s1032_s21   ;;  %s141_s25 = sadd.s32 1, %s1028_s20 }
   0x6   : > { %s138_s26 = ssub.s32 %s1032_s21, %s1093_s24  ;;  %p151_p0 = scmp.ne.s32.totalorder %s1028_s20, %s1024_s19 }
   0x7   : > { %p139_p1 = scmp.eq.s32.totalorder %s138_s26, 0  ;;  %p152_p2 = scmp.eq.s32.totalorder %s1089_s22, 1 }
   0x8   : > { %p157_p3 = scmp.ne.s32.totalorder %s1024_s19, %s1020_s18  ;;  %p158_p4 = scmp.eq.s32.totalorder %s758_s23, 1 }
   0x9   : > { %s1104_s27 = scalar_select %p139_p1, %s1028_s20, %s141_s25  }
   0xa   : > { %p1106_p5 = por %p152_p2, %p151_p0  ;;  %p1110_p6 = por %p158_p4, %p157_p3 }
   0xb   : > { %p759_p7 = scmp.ge.s32.totalorder %s1032_s21, 1  ;;  %p165_p8 = scmp.lt.s32.totalorder %s1032_s21, 3 }
   0xc   : > { %p913_p9 = scmp.eq.s32.totalorder %s1089_s22, 0  ;;  %s178_s8 = sshll.u32 %s1322_s0, 4  ;;  %s179_s8 = int_to_ptr.vmem [resolvable:$true] %s178_s8 }
   0xd   : > { %p1117_p10 = pnand %p759_p7, %p165_p8  ;;  %s953_s9 = scalar_lea.vmem %s179_s8, 16 }
   0xe   : > { %p954_p13 = scmp.ne.s32.totalorder %s179_s8, %s953_s9  ;;  %p961_p3 = scmp.lt.s32.totalorder %s179_s8, %s179_s8 }
   0xf   : > { %p905_p11 = pneg %p1117_p10  ;;  %p962_p4 = scmp.lt.s32.totalorder %s953_s9, %s953_s9 }
  0x11   : > { %p906_p12 = pnand %p913_p9, %p905_p11  ;;  %p963_p7 = por %p962_p4, %p961_p3 }
  0x13   : > { %p955_p0 = pneg %p906_p12 }
  0x15   : > { %p956_p1 = pnand %p955_p0, %p954_p13 }
  0x17   : > { %p957_p2 = pneg %p956_p1 }
  0x19   : > { %p964_p8 = pnand %p963_p7, %p957_p2 }
  0x1b   : > { %967 = shalt.err (!%p964_p8)
}
  0x1c   : > { %s1034_s10 = smov [#allocation2]   ;;  %213 = sbr.rel (%p1117_p10) target bundleno = 572 (0x23c), region = 40 }
  0x1d   : > { %908 = dma.vmem_to_smem (!%p906_p12), %s179_s8, 16, %s1034_s10, [#allocation4]  }
  0x21   : > { %1011 = dma.done.wait (%p913_p9), [#allocation4], 16  }
  0x22   : > { %1013 = vsyncadd (%p913_p9), [#allocation4], 4294967280 }
  0x23   : > { %219 = sfence }
  0x24   : > { %v280_v0 = vld [vmem:[%s1325_s3 + $0x78] sm:$0xff]  ;;  %v279_v1 = vld [vmem:[%s1325_s3 + $0x70] sm:$0xff]  ;;  %p247_p11 = scmp.lt.s32.totalorder %s1089_s22, 1  ;;  %v278_v2 = vld [vmem:[%s1325_s3 + $0x68] sm:$0xff]  ;;  %vm399_vm0 = vcmask 523264   ;;  %s778_s11 = sld [smem:[#allocation2 + $0x1]] }
  0x25   : > { %827 = vmatprep.subr.mxu0 %v280_v0  ;;  %v277_v3 = vld [vmem:[%s1325_s3 + $0x60] sm:$0xff]  ;;  %v276_v4 = vld [vmem:[%s1325_s3 + $0x58] sm:$0xff]  ;;  %v275_v6 = vld [vmem:[%s1325_s3 + $0x50] sm:$0xff]  ;;  %s244_s12 = sand.u32 1, %s1024_s19   ;;  %s786_s16 = sshll.u32 %s1089_s22, 10 }
  0x26   : > { %828 = vmatpush3.msra.mxu0 %v280_v0  ;;  %s1145_s17 = scalar_select %p247_p11, %s1089_s22, 1  ;;  %v274_v7 = vld [vmem:[%s1325_s3 + $0x48] sm:$0xff]  ;;  %v273_v8 = vld [vmem:[%s1325_s3 + $0x40] sm:$0xff]  ;;  %v272_v9 = vld [vmem:[%s1325_s3 + $0x38] sm:$0xff] }
  0x27   : > { %829 = vmatprep.subr.mxu0 %v279_v1  ;;  %v271_v10 = vld [vmem:[%s1325_s3 + $0x30] sm:$0xff]  ;;  %v270_v11 = vld [vmem:[%s1325_s3 + $0x28] sm:$0xff]  ;;  %v269_v12 = vld [vmem:[%s1325_s3 + $0x20] sm:$0xff]  ;;  %s764_s15 = sshll.u32 %s244_s12, 6  ;;  %s1268_s6 = scalar_lea.hbm %s1327_s5, %s786_s16 }
  0x28   : > { %830 = vmatpush3.msra.mxu0 %v279_v1  ;;  %s784_s26 = sshll.u32 %s1145_s17, 6  ;;  %v268_v13 = vld [vmem:[%s1325_s3 + $0x18] sm:$0xff]  ;;  %v267_v14 = vld [vmem:[%s1325_s3 + $0x10] sm:$0xff]  ;;  %v266_v15 = vld [vmem:[%s1325_s3 + $0x8] sm:$0xff]  ;;  %s529_s17 = sld [smem:[#allocation2]] }
  0x29   : > { %831 = vmatprep.subr.mxu0 %v278_v2  ;;  %s1156_s7 = scalar_lea.vmem %s1324_s2, %s784_s26  ;;  %v265_v16 = vld [vmem:[%s1325_s3] sm:$0xff]  ;;  %s1207_s8 = scalar_lea.vmem %s1323_s1, %s784_s26 }
  0x2a   : > { %832 = vmatpush3.msra.mxu0 %v278_v2  ;;  %v257_v5 = vld [vmem:[%s1156_s7] sm:$0xff]  ;;  %v258_v17 = vld [vmem:[%s1156_s7 + $0x8] sm:$0xff]  ;;  %v259_v18 = vld [vmem:[%s1156_s7 + $0x10] sm:$0xff]  ;;  %s1262_s23 = scalar_lea.vmem [#allocation5], %s764_s15  ;;  %s1035_s26 = smov [#allocation5]  }
  0x2b   : > { %833 = vmatprep.subr.mxu0 %v277_v3  ;;  %859 = vmatprep.mubr.f32.mxu0 %v257_v5  ;;  %v260_v19 = vld [vmem:[%s1156_s7 + $0x18] sm:$0xff]  ;;  %v261_v20 = vld [vmem:[%s1156_s7 + $0x20] sm:$0xff]  ;;  %v262_v21 = vld [vmem:[%s1156_s7 + $0x28] sm:$0xff]  ;;  %s672_s25 = sshll.u32 %s1262_s23, 4  ;;  %s1270_s25 = int_to_ptr.vmem [resolvable:$true] %s672_s25 }
  0x2c   : > { %834 = vmatpush3.msra.mxu0 %v277_v3  ;;  %v263_v22 = vld [vmem:[%s1156_s7 + $0x30] sm:$0xff]  ;;  %v264_v23 = vld [vmem:[%s1156_s7 + $0x38] sm:$0xff]  ;;  %v386_v24 = vld [vmem:[%s1207_s8] sm:$0xff]  ;;  %s972_s7 = sshll.u32 %s1035_s26, 4  ;;  %s973_s7 = int_to_ptr.vmem [resolvable:$false] %s972_s7 }
  0x2d   : > { %835 = vmatprep.subr.mxu0 %v276_v4  ;;  %887 = vmatprep.mubr.msk.f32.mxu1 %vm399_vm0, %v386_v24  ;;  %v387_v33 = vld [vmem:[%s1207_s8 + $0x8] sm:$0xff]  ;;  %v388_v34 = vld [vmem:[%s1207_s8 + $0x10] sm:$0xff]  ;;  %v389_v35 = vld [vmem:[%s1207_s8 + $0x18] sm:$0xff]  ;;  %s974_s9 = scalar_lea.vmem %s973_s7, 2048  ;;  %p975_p13 = scmp.lt.s32.totalorder %s1270_s25, %s973_s7 }
  0x2e   : > { %836 = vmatpush3.msra.mxu0 %v276_v4  ;;  %v390_v36 = vld [vmem:[%s1207_s8 + $0x20] sm:$0xff]  ;;  %v391_v37 = vld [vmem:[%s1207_s8 + $0x28] sm:$0xff]  ;;  %v392_v38 = vld [vmem:[%s1207_s8 + $0x30] sm:$0xff]  ;;  %v538_v42 = vstv %s529_s17  ;;  %s968_s17 = scalar_lea.vmem %s1270_s25, 1024 }
  0x2f   : > { %837 = vmatprep.subr.mxu0 %v275_v6  ;;  %v393_v39 = vld [vmem:[%s1207_s8 + $0x38] sm:$0xff]  ;;  %v769_v40 = vld [vmem:[%s1326_s4] ss:$0 sm:$0xff]  ;;  %s1282_s8 = scalar_lea.sflag [#allocation3], %s244_s12  ;;  %p969_p9 = scmp.ne.s32.totalorder %s1270_s25, %s968_s17 }
  0x30   : > { %838 = vmatpush3.msra.mxu0 %v275_v6  ;;  %p976_p0 = scmp.lt.s32.totalorder %s974_s9, %s968_s17 }
  0x31   : > { %839 = vmatprep.subr.mxu0 %v274_v7  ;;  %p970_p10 = pnand %p969_p9, %p1106_p5 }
  0x32   : > { %840 = vmatpush3.msra.mxu0 %v274_v7  ;;  %p977_p1 = por %p976_p0, %p975_p13 }
  0x33   : > { %841 = vmatprep.subr.mxu0 %v273_v8  ;;  %p971_p12 = pneg %p970_p10 }
  0x34   : > { %842 = vmatpush3.msra.mxu0 %v273_v8 }
  0x35   : > { %843 = vmatprep.subr.mxu0 %v272_v9  ;;  %p978_p2 = pnand %p977_p1, %p971_p12 }
  0x36   : > { %844 = vmatpush3.msra.mxu0 %v272_v9 }
  0x37   : > { %845 = vmatprep.subr.mxu0 %v271_v10 }
  0x38   : > { %846 = vmatpush3.msra.mxu0 %v271_v10 }
  0x39   : > { %847 = vmatprep.subr.mxu0 %v270_v11 }
  0x3a   : > { %848 = vmatpush3.msra.mxu0 %v270_v11 }
  0x3b   : > { %849 = vmatprep.subr.mxu0 %v269_v12 }
  0x3c   : > { %850 = vmatpush3.msra.mxu0 %v269_v12 }
  0x3d   : > { %851 = vmatprep.subr.mxu0 %v268_v13 }
  0x3e   : > { %852 = vmatpush3.msra.mxu0 %v268_v13 }
  0x3f   : > { %853 = vmatprep.subr.mxu0 %v267_v14 }
  0x40   : > { %854 = vmatpush3.msra.mxu0 %v267_v14 }
  0x41   : > { %855 = vmatprep.subr.mxu0 %v266_v15 }
  0x42   : > { %856 = vmatpush3.msra.mxu0 %v266_v15 }
  0x43   : > { %857 = vmatprep.subr.mxu0 %v265_v16 }
  0x44   : > { %858 = vmatpush3.msra.mxu0 %v265_v16 }
  0x45   : > { %860 = vmatmul.mubr.f32.vlgmr.msra.gmra.mxu0 %v258_v17 }
  0x46   : > { %862 = vmatprep.mubr.f32.mxu0 %v259_v18 }
  0x49   : > { %863 = vmatmul.mubr.f32.gmra.mxu0 %v260_v19 }
  0x4a   : > { %865 = vmatprep.mubr.f32.mxu0 %v261_v20 }
  0x4d   : > { %866 = vmatmul.mubr.f32.gmra.mxu0 %v262_v21 }
  0x4e   : > { %868 = vmatprep.mubr.f32.mxu0 %v263_v22 }
  0x51   : > { %869 = vmatmul.mubr.f32.gmra.mxu0 %v264_v23 }
 0x105   : > { %v861_v25 = vpop.f32.mrf.mxu0 }
 0x107   : > { %v347_v26 = vpop.f32.mrf.mxu0 }
 0x109   : > { %v864_v27 = vpop.f32.mrf.mxu0 }
 0x10b   : > { %v357_v28 = vpop.f32.mrf.mxu0 }
 0x10d   : > { %v867_v29 = vpop.f32.mrf.mxu0 }
 0x10f   : > { %v367_v30 = vpop.f32.mrf.mxu0 }
 0x111   : > { %v870_v31 = vpop.f32.mrf.mxu0 }
 0x112   : > { %871 = vmatprep.subr.mxu1 %v870_v31 }
 0x113   : > { %v377_v32 = vpop.f32.mrf.mxu0  ;;  %872 = vmatpush3.msra.mxu1 %v870_v31 }
 0x114   : > { %873 = vmatprep.subr.mxu1 %v377_v32 }
 0x115   : > { %874 = vmatpush3.msra.mxu1 %v377_v32 }
 0x116   : > { %875 = vmatprep.subr.mxu1 %v867_v29 }
 0x117   : > { %876 = vmatpush3.msra.mxu1 %v867_v29 }
 0x118   : > { %877 = vmatprep.subr.mxu1 %v367_v30 }
 0x119   : > { %878 = vmatpush3.msra.mxu1 %v367_v30 }
 0x11a   : > { %879 = vmatprep.subr.mxu1 %v864_v27 }
 0x11b   : > { %880 = vmatpush3.msra.mxu1 %v864_v27 }
 0x11c   : > { %881 = vmatprep.subr.mxu1 %v357_v28 }
 0x11d   : > { %882 = vmatpush3.msra.mxu1 %v357_v28 }
 0x11e   : > { %883 = vmatprep.subr.mxu1 %v861_v25 }
 0x11f   : > { %884 = vmatpush3.msra.mxu1 %v861_v25 }
 0x120   : > { %885 = vmatprep.subr.mxu1 %v347_v26 }
 0x121   : > { %886 = vmatpush3.msra.mxu1 %v347_v26 }
 0x122   : > { %888 = vmatmul.mubr.msk.f32.vlgmr.msra.gmra.mxu1 %vm399_vm0, %v387_v33 }
 0x123   : > { %890 = vmatprep.mubr.msk.f32.mxu1 %vm399_vm0, %v388_v34 }
 0x126   : > { %891 = vmatmul.mubr.msk.f32.gmra.mxu1 %vm399_vm0, %v389_v35 }
 0x127   : > { %893 = vmatprep.mubr.msk.f32.mxu1 %vm399_vm0, %v390_v36 }
 0x12a   : > { %894 = vmatmul.mubr.msk.f32.gmra.mxu1 %vm399_vm0, %v391_v37 }
 0x12b   : > { %896 = vmatprep.mubr.msk.f32.mxu1 %vm399_vm0, %v392_v38 }
 0x12e   : > { %897 = vmatmul.mubr.msk.f32.gmra.mxu1 %vm399_vm0, %v393_v39 }
 0x1e2   : > { %v889_v41 = vpop.f32.mrf.mxu1 }
 0x1e3   : > { %v496_v43 = vadd.f32 %v889_v41, %v769_v40 }
 0x1e4   : > { %v490_v44 = vpop.f32.mrf.mxu1 }
 0x1e5   : > { %v540_v45 = vmul.f32 %v538_v42, %v496_v43  ;;  %v491_v46 = vadd.f32 %v769_v40, %v490_v44  ;;  %vm531_vm1 = vcmp.gt.f32.partialorder %v496_v43, 0.0 }
 0x1e6   : > { %v892_v47 = vpop.f32.mrf.mxu1 }
 0x1e7   : > { %vm530_vm2 = vcmp.gt.f32.partialorder %v491_v46, 0.0  ;;  %v539_v48 = vmul.f32 %v538_v42, %v491_v46  ;;  %v506_v49 = vadd.f32 %v892_v47, %v769_v40  ;;  %v1228_v51 = vsel %vm531_vm1, %v496_v43, %v540_v45 }
 0x1e8   : > { %v500_v50 = vpop.f32.mrf.mxu1  ;;  %v570_v59 = vmul.f32 %v1228_v51, %v1228_v51 }
 0x1e9   : > { %v1230_v52 = vsel %vm530_vm2, %v491_v46, %v539_v48  ;;  %v542_v53 = vmul.f32 %v538_v42, %v506_v49  ;;  %v501_v54 = vadd.f32 %v769_v40, %v500_v50  ;;  %vm533_vm3 = vcmp.gt.f32.partialorder %v506_v49, 0.0 }
 0x1ea   : > { %v569_v55 = vmul.f32 %v1230_v52, %v1230_v52  ;;  %v895_v56 = vpop.f32.mrf.mxu1  ;;  %v555_v60 = vadd.f32 %v1228_v51, %v1230_v52 }
 0x1eb   : > { %vm532_vm4 = vcmp.gt.f32.partialorder %v501_v54, 0.0  ;;  %v541_v57 = vmul.f32 %v538_v42, %v501_v54  ;;  %v516_v58 = vadd.f32 %v895_v56, %v769_v40  ;;  %v1238_v62 = vsel %vm533_vm3, %v506_v49, %v542_v53  ;;  %v593_v53 = vld [vmem:[%s1326_s4 + $0x1] sm:$0x1] }
 0x1ec   : > { %v510_v61 = vpop.f32.mrf.mxu1  ;;  %v577_v2 = vadd.f32 %v570_v59, %v569_v55  ;;  %v572_v8 = vmul.f32 %v1238_v62, %v1238_v62  ;;  %v600_v49 = vlaneseq }
 0x1ed   : > { %v1240_v63 = vsel %vm532_vm4, %v501_v54, %v541_v57  ;;  %v544_v0 = vmul.f32 %v538_v42, %v516_v58  ;;  %v511_v1 = vadd.f32 %v769_v40, %v510_v61  ;;  %vm535_vm5 = vcmp.gt.f32.partialorder %v516_v58, 0.0  ;;  %v597_v57 = vld [vmem:[%s1326_s4 + $0x2] sm:$0x1] }
 0x1ee   : > { %v556_v3 = vadd.f32 %v555_v60, %v1240_v63  ;;  %v571_v4 = vmul.f32 %v1240_v63, %v1240_v63  ;;  %v898_v5 = vpop.f32.mrf.mxu1  ;;  %v601_v50 = vshrl.u32 %v600_v49, 7 }
 0x1ef   : > { %vm534_vm6 = vcmp.gt.f32.partialorder %v511_v1, 0.0  ;;  %v543_v6 = vmul.f32 %v538_v42, %v511_v1  ;;  %v526_v7 = vadd.f32 %v898_v5, %v769_v40  ;;  %v552_v12 = vsel %vm535_vm5, %v516_v58, %v544_v0 }
 0x1f0   : > { %v578_v9 = vadd.f32 %v577_v2, %v571_v4  ;;  %v557_v10 = vadd.f32 %v556_v3, %v1238_v62  ;;  %v520_v11 = vpop.f32.mrf.mxu1  ;;  %v574_v20 = vmul.f32 %v552_v12, %v552_v12  ;;  %v602_v54 = vsub.s32 0, %v601_v50 }
 0x1f1   : > { %v551_v13 = vsel %vm534_vm6, %v511_v1, %v543_v6  ;;  %v546_v14 = vmul.f32 %v538_v42, %v526_v7  ;;  %v521_v15 = vadd.f32 %v769_v40, %v520_v11  ;;  %vm537_vm7 = vcmp.gt.f32.partialorder %v526_v7, 0.0 }
 0x1f2   : > { %v558_v16 = vadd.f32 %v557_v10, %v551_v13  ;;  %v573_v17 = vmul.f32 %v551_v13, %v551_v13  ;;  %v579_v18 = vadd.f32 %v578_v9, %v572_v8  ;;  %v633_v0 = vstv %s778_s11 }
 0x1f3   : > { %vm536_vm8 = vcmp.gt.f32.partialorder %v521_v15, 0.0  ;;  %v545_v19 = vmul.f32 %v538_v42, %v521_v15  ;;  %v554_v23 = vsel %vm537_vm7, %v526_v7, %v546_v14 }
 0x1f4   : > { %v580_v21 = vadd.f32 %v579_v18, %v573_v17  ;;  %v559_v22 = vadd.f32 %v558_v16, %v552_v12  ;;  %v576_v28 = vmul.f32 %v554_v23, %v554_v23 }
 0x1f5   : > { %v553_v24 = vsel %vm536_vm8, %v521_v15, %v545_v19 }
 0x1f6   : > { %v560_v25 = vadd.f32 %v559_v22, %v553_v24  ;;  %v575_v26 = vmul.f32 %v553_v24, %v553_v24  ;;  %v581_v27 = vadd.f32 %v580_v21, %v574_v20 }
 0x1f8   : > { %v561_v29 = vadd.f32 %v560_v25, %v554_v23  ;;  %v582_v30 = vadd.f32 %v581_v27, %v575_v26 }
 0x1fa   : > { %v562_v31 = vrot.slane %v561_v29, 4  ;;  %v583_v32 = vadd.f32 %v582_v30, %v576_v28 }
 0x1fc   : > { %v563_v33 = vadd.f32 %v562_v31, %v561_v29  ;;  %v584_v34 = vrot.slane %v583_v32, 4 }
 0x1fe   : > { %v564_v35 = vrot.slane %v563_v33, 2  ;;  %v585_v36 = vadd.f32 %v584_v34, %v583_v32 }
 0x200   : > { %v565_v37 = vadd.f32 %v564_v35, %v563_v33  ;;  %v586_v38 = vrot.slane %v585_v36, 2 }
 0x202   : > { %v566_v39 = vrot.slane %v565_v37, 1  ;;  %v587_v40 = vadd.f32 %v586_v38, %v585_v36 }
 0x204   : > { %v567_v41 = vadd.f32 %v566_v39, %v565_v37  ;;  %v588_v42 = vrot.slane %v587_v40, 1 }
 0x206   : > { %v568_v43 = vmul.f32 0.015625, %v567_v41  ;;  %v589_v44 = vadd.f32 %v588_v42, %v587_v40 }
 0x208   : > { %v590_v45 = vmul.f32 0.015625, %v589_v44  ;;  %v591_v46 = vmul.f32 %v568_v43, %v568_v43 }
 0x20a   : > { %v592_v47 = vsub.f32 %v590_v45, %v591_v46 }
 0x20c   : > { %v594_v48 = vadd.f32 1e-05, %v592_v47 }
 0x20e   : > { %951 = vrsqrt.f32 %v594_v48 }
 0x21b   : > { %v952_v55 = vpop.eup %951 }
 0x21c   : > { %v596_v56 = vmul.f32 %v952_v55, %v593_v53 }
 0x21e   : > { %v598_v58 = vmul.f32 %v596_v56, %v568_v43  ;;  %v603_v59 = vrot.slane %v596_v56, %v602_v54 }
 0x220   : > { %v599_v60 = vsub.f32 %v597_v57, %v598_v58  ;;  %v604_v61 = vmul.f32 %v603_v59, %v1230_v52  ;;  %v605_v1 = vmul.f32 %v603_v59, %v1228_v51  ;;  %v606_v2 = vmul.f32 %v603_v59, %v1240_v63 }
 0x221   : > { %v607_v3 = vmul.f32 %v603_v59, %v1238_v62  ;;  %v608_v5 = vmul.f32 %v603_v59, %v551_v13  ;;  %v609_v6 = vmul.f32 %v603_v59, %v552_v12  ;;  %v610_v7 = vmul.f32 %v603_v59, %v553_v24 }
 0x222   : > { %v615_v4 = vrot.slane %v599_v60, %v602_v54  ;;  %v611_v8 = vmul.f32 %v603_v59, %v554_v23 }
 0x224   : > { %v616_v9 = vadd.f32 %v615_v4, %v604_v61  ;;  %v617_v10 = vadd.f32 %v615_v4, %v605_v1  ;;  %v618_v11 = vadd.f32 %v615_v4, %v606_v2  ;;  %v619_v14 = vadd.f32 %v615_v4, %v607_v3 }
 0x225   : > { %v620_v15 = vadd.f32 %v615_v4, %v608_v5  ;;  %v621_v16 = vadd.f32 %v615_v4, %v609_v6  ;;  %v622_v52 = vadd.f32 %v615_v4, %v610_v7  ;;  %v623_v17 = vadd.f32 %v615_v4, %v611_v8 }
 0x226   : > { %v634_v18 = vmul.f32 %v633_v0, %v616_v9  ;;  %v635_v51 = vmul.f32 %v633_v0, %v617_v10  ;;  %v636_v19 = vmul.f32 %v633_v0, %v618_v11  ;;  %v637_v63 = vmul.f32 %v633_v0, %v619_v14 }
 0x227   : > { %vm631_vm9 = vcmp.gt.f32.partialorder %v622_v52, 0.0  ;;  %v638_v62 = vmul.f32 %v633_v0, %v620_v15  ;;  %v639_v12 = vmul.f32 %v633_v0, %v621_v16  ;;  %v640_v13 = vmul.f32 %v633_v0, %v622_v52 }
 0x228   : > { %v641_v20 = vmul.f32 %v633_v0, %v623_v17  ;;  %vm625_vm10 = vcmp.gt.f32.partialorder %v616_v9, 0.0  ;;  %vm626_vm11 = vcmp.gt.f32.partialorder %v617_v10, 0.0  ;;  %vm627_vm12 = vcmp.gt.f32.partialorder %v618_v11, 0.0 }
 0x229   : > { %v648_v21 = vsel %vm631_vm9, %v622_v52, %v640_v13  ;;  %vm628_vm13 = vcmp.gt.f32.partialorder %v619_v14, 0.0  ;;  %vm629_vm14 = vcmp.gt.f32.partialorder %v620_v15, 0.0  ;;  %vm630_vm15 = vcmp.gt.f32.partialorder %v621_v16, 0.0 }
 0x22a   : > { %656 = vst [vmem:[%s1262_s23 + $0x30] sm:$0xff] %v648_v21  ;;  %vm632_vm0 = vcmp.gt.f32.partialorder %v623_v17, 0.0  ;;  %v642_v22 = vsel %vm625_vm10, %v616_v9, %v634_v18  ;;  %v643_v23 = vsel %vm626_vm11, %v617_v10, %v635_v51  ;;  %v644_v24 = vsel %vm627_vm12, %v618_v11, %v636_v19 }
 0x22b   : > { %v645_v25 = vsel %vm628_vm13, %v619_v14, %v637_v63  ;;  %v646_v26 = vsel %vm629_vm14, %v620_v15, %v638_v62  ;;  %v647_v27 = vsel %vm630_vm15, %v621_v16, %v639_v12  ;;  %v649_v28 = vsel %vm632_vm0, %v623_v17, %v641_v20  ;;  %650 = vst [vmem:[%s1262_s23] sm:$0xff] %v642_v22 }
 0x22c   : > { %651 = vst [vmem:[%s1262_s23 + $0x8] sm:$0xff] %v643_v23  ;;  %652 = vst [vmem:[%s1262_s23 + $0x10] sm:$0xff] %v644_v24 }
 0x22d   : > { %653 = vst [vmem:[%s1262_s23 + $0x18] sm:$0xff] %v645_v25  ;;  %654 = vst [vmem:[%s1262_s23 + $0x20] sm:$0xff] %v646_v26 }
 0x22e   : > { %655 = vst [vmem:[%s1262_s23 + $0x28] sm:$0xff] %v647_v27  ;;  %657 = vst [vmem:[%s1262_s23 + $0x38] sm:$0xff] %v649_v28 }
 0x22f   : > { %981 = shalt.err (!%p978_p2)
}
 0x230   : > { %s982_s10 = scalar_lea.hbm %s1268_s6, 1024  ;;  %s986_s13 = scalar_lea.hbm %s1327_s5, 2048 }
 0x231   : > { %p983_p3 = scmp.ne.s32.totalorder %s1268_s6, %s982_s10  ;;  %p987_p8 = scmp.lt.s32.totalorder %s1268_s6, %s1327_s5 }
 0x232   : > { %p988_p11 = scmp.lt.s32.totalorder %s986_s13, %s982_s10 }
 0x233   : > { %p984_p4 = pnand %p983_p3, %p1106_p5 }
 0x234   : > { %p989_p9 = por %p988_p11, %p987_p8 }
 0x235   : > { %p985_p7 = pneg %p984_p4 }
 0x237   : > { %p990_p10 = pnand %p989_p9, %p985_p7 }
 0x239   : > { %993 = shalt.err (!%p990_p10)
}
 0x23a   : > { %s1036_s16 = smov 128   ;;  %s1037_s23 = smov 8  }
 0x23b   : > { %903 = dma.vmem_to_hbm [thread:$0]  (%p1106_p5), %s1270_s25, 1024, %s1268_s6, %s1282_s8, %s1036_s16, %s1036_s16, %s1037_s23  }
 0x23c PF: > { %p915_p12 = scmp.ge.s32.totalorder %s1032_s21, 2  ;;  %s687_s22 = sand.u32 1, %s1020_s18  }
 0x23d   : > { %s688_s30 = scalar_lea.sflag [#allocation3], %s687_s22 }
 0x23e   : > { %p910_p13 = pnand %p915_p12, %p1110_p6 }
 0x240   : > { %p911_p0 = pneg %p910_p13 }
 0x242   : > { %1015 = dma.done.wait (%p911_p0), %s688_s30, 1024  }
 0x243   : > { %1017 = vsyncadd (%p911_p0), %s688_s30, 4294966272  ;;  %p16_p1 = scmp.ge.s32.totalorder %s1093_s24, 4   ;;  %s1331_s18 = smov %s1024_s19 }
 0x244   : > { %s1332_s19 = smov %s1028_s20  ;;  %s1333_s20 = smov %s1104_s27 }
 0x245   : > { %s1334_s21 = smov %s1093_s24  ;;  %18 = sbr.rel (!%p16_p1) target bundleno = 4 (0x4), region = 83 }
 0x24a   :  { %693 = vsyncpa [#allocation3], 1 }
 0x24b   :  { %695 = vsyncpa [#allocation3 + $0x1], 1 }
 0x24c   :  { %696 = vsyncpa [#allocation4], 1 }
 0x24d   :  { %698 = vsyncpa [#allocation4 + $0x1], 1 }

</bundles_post_ra>
